<compile_context>
chip_gen: v6e
topology: v6e:2x2x1
jax: 0.10.0
libtpu: 0.0.40
codegen_flags: <defaults>
</compile_context>

<pallas_src>
import functools

import jax
import jax.numpy as jnp
from jax.experimental import pallas as pl
from jax.experimental.pallas import tpu as pltpu


D_NOISE = 100
D_HIDDEN = 256
D_OUT = 28 * 28          # 784
DROPOUT_P = 0.1

D_NOISE_PAD = 128        # 100 -> 1 * 128
D_OUT_PAD = 896          # 784 -> 7 * 128


def _round_up(x, m):
    return (x + m - 1) // m * m


def _g_kernel(z_ref,                 # (TILE_B, 128)  bf16/f32
              w1_ref, b1_ref,        # (128, 256) bf16, (1, 256) f32
              w2_ref, b2_ref,        # (256, 256) bf16, (1, 256) f32
              w3_ref, b3_ref,        # (256, 896) bf16, (1, 896) f32
              *rest,                 # [m1, m2,] o_ref
              training):
    if training:
        m1_ref, m2_ref, o_ref = rest
    else:
        (o_ref,) = rest

    # ---- Linear 1 + ReLU (+ Dropout) ------------------------------------
    x = z_ref[...].astype(jnp.bfloat16)
    h = jnp.dot(x, w1_ref[...], preferred_element_type=jnp.float32) + b1_ref[...]
    h = jnp.maximum(h, 0.0)
    if training:
        h = h * m1_ref[...]          # mask already scaled by 1/(1-p)

    # ---- Linear 2 + ReLU (+ Dropout) ------------------------------------
    h2 = jnp.dot(h.astype(jnp.bfloat16), w2_ref[...],
                 preferred_element_type=jnp.float32) + b2_ref[...]
    h2 = jnp.maximum(h2, 0.0)
    if training:
        h2 = h2 * m2_ref[...]

    # ---- Linear 3 + Tanh -------------------------------------------------
    out = jnp.dot(h2.astype(jnp.bfloat16), w3_ref[...],
                  preferred_element_type=jnp.float32) + b3_ref[...]
    o_ref[...] = jnp.tanh(out).astype(o_ref.dtype)


def g_forward(z, params, *, dropout_key=None, p=DROPOUT_P, training=True):
    """Generator forward pass. z: (B, 100) f32 -> (B, 784) f32."""
    w1, b1, w2, b2, w3, b3 = params
    B = z.shape[0]
    assert z.shape[1] == D_NOISE

    # --- batch tiling -----------------------------------------------------
    tile_b = 256 if B >= 256 else _round_up(B, 8)
    b_pad = _round_up(B, tile_b)
    n_tiles = b_pad // tile_b

    # --- pad + cast parameters (zero pad rows/cols are exact no-ops) ------
    w1p = jnp.zeros((D_NOISE_PAD, D_HIDDEN), jnp.bfloat16)
    w1p = w1p.at[:D_NOISE, :].set(w1.astype(jnp.bfloat16))
    w2p = w2.astype(jnp.bfloat16)
    w3p = jnp.zeros((D_HIDDEN, D_OUT_PAD), jnp.bfloat16)
    w3p = w3p.at[:, :D_OUT].set(w3.astype(jnp.bfloat16))
    b1p = b1.reshape(1, D_HIDDEN).astype(jnp.float32)
    b2p = b2.reshape(1, D_HIDDEN).astype(jnp.float32)
    b3p = jnp.zeros((1, D_OUT_PAD), jnp.float32)
    b3p = b3p.at[:, :D_OUT].set(b3.reshape(1, D_OUT).astype(jnp.float32))

    # --- pad noise input (batch + lane) ------------------------------------
    zp = jnp.zeros((b_pad, D_NOISE_PAD), jnp.float32)
    zp = zp.at[:B, :D_NOISE].set(z.astype(jnp.float32))

    resident = lambda arr: pl.BlockSpec(arr.shape, lambda i: (0, 0))

    inputs = [zp, w1p, b1p, w2p, b2p, w3p, b3p]
    in_specs = [
        pl.BlockSpec((tile_b, D_NOISE_PAD), lambda i: (i, 0)),
        resident(w1p), resident(b1p),
        resident(w2p), resident(b2p),
        resident(w3p), resident(b3p),
    ]

    apply_dropout = bool(training) and p > 0.0
    if apply_dropout:
        if dropout_key is None:
            dropout_key = jax.random.PRNGKey(0)
        k1, k2 = jax.random.split(dropout_key)
        scale = 1.0 / (1.0 - p)
        m1 = jax.random.bernoulli(k1, 1.0 - p, (b_pad, D_HIDDEN)).astype(jnp.float32) * scale
        m2 = jax.random.bernoulli(k2, 1.0 - p, (b_pad, D_HIDDEN)).astype(jnp.float32) * scale
        inputs += [m1, m2]
        in_specs += [
            pl.BlockSpec((tile_b, D_HIDDEN), lambda i: (i, 0)),
            pl.BlockSpec((tile_b, D_HIDDEN), lambda i: (i, 0)),
        ]

    kernel = functools.partial(_g_kernel, training=apply_dropout)

    out = pl.pallas_call(
        kernel,
        out_shape=jax.ShapeDtypeStruct((b_pad, D_OUT_PAD), jnp.float32),
        grid=(n_tiles,),
        in_specs=in_specs,
        out_specs=pl.BlockSpec((tile_b, D_OUT_PAD), lambda i: (i, 0)),
        compiler_params=pltpu.CompilerParams(
            dimension_semantics=("parallel",),
        ),
    )(*inputs)

    return out[:B, :D_OUT]


def init_params(key):
    """Weights in (in, out) layout, U(-1/sqrt(fan_in), 1/sqrt(fan_in)) init
    (same family as torch's default Linear init)."""
    def linear(k, fan_in, fan_out):
        kw, kb = jax.random.split(k)
        bound = 1.0 / (fan_in ** 0.5)
        w = jax.random.uniform(kw, (fan_in, fan_out), jnp.float32, -bound, bound)
        b = jax.random.uniform(kb, (1, fan_out), jnp.float32, -bound, bound)
        return w, b

    k1, k2, k3 = jax.random.split(key, 3)
    w1, b1 = linear(k1, D_NOISE, D_HIDDEN)
    w2, b2 = linear(k2, D_HIDDEN, D_HIDDEN)
    w3, b3 = linear(k3, D_HIDDEN, D_OUT)
    return (w1, b1, w2, b2, w3, b3)


if __name__ == "__main__":
    key = jax.random.PRNGKey(0)
    kp, kz, kd = jax.random.split(key, 3)

    params = init_params(kp)

    B = 8
    z = jax.random.normal(kz, (B, D_NOISE), dtype=jnp.float32)

    img_fake = g_forward(z, params, dropout_key=kd, training=True)
    img_fake = jax.block_until_ready(img_fake)

    assert img_fake.shape == (B, D_OUT), img_fake.shape
    assert img_fake.dtype == jnp.float32
    # tanh output must lie in [-1, 1]
    assert float(jnp.max(jnp.abs(img_fake))) <= 1.0 + 1e-6

    # also exercise the eval (no-dropout) path
    img_eval = jax.block_until_ready(g_forward(z, params, training=False))
    assert img_eval.shape == (B, D_OUT)

    print("KERNEL_OK")
</pallas_src>

<mosaic_0001>
module attributes {stable_mosaic.version = 11 : i64} {
  func.func @_g_kernel(%arg0: i32, %arg1: memref<8x128xf32, #tpu.memory_space<vmem>>, %arg2: memref<128x256xbf16, #tpu.memory_space<vmem>>, %arg3: memref<1x256xf32, #tpu.memory_space<vmem>>, %arg4: memref<256x256xbf16, #tpu.memory_space<vmem>>, %arg5: memref<1x256xf32, #tpu.memory_space<vmem>>, %arg6: memref<256x896xbf16, #tpu.memory_space<vmem>>, %arg7: memref<1x896xf32, #tpu.memory_space<vmem>>, %arg8: memref<8x256xf32, #tpu.memory_space<vmem>>, %arg9: memref<8x256xf32, #tpu.memory_space<vmem>>, %arg10: memref<8x896xf32, #tpu.memory_space<vmem>>) attributes {dimension_semantics = [#tpu.dimension_semantics<parallel>], iteration_bounds = array<i64: 1>, scalar_prefetch = 0 : i64, scratch_operands = 0 : i64, tpu.core_type = #tpu.core_type<tc>, window_params = [{transform_indices = @transform_0, window_bounds = array<i64: 8, 128>}, {pipeline_mode = #tpu.pipeline_mode<synchronous>, transform_indices = @transform_1, window_bounds = array<i64: 128, 256>}, {pipeline_mode = #tpu.pipeline_mode<synchronous>, transform_indices = @transform_2, window_bounds = array<i64: 1, 256>}, {pipeline_mode = #tpu.pipeline_mode<synchronous>, transform_indices = @transform_3, window_bounds = array<i64: 256, 256>}, {pipeline_mode = #tpu.pipeline_mode<synchronous>, transform_indices = @transform_4, window_bounds = array<i64: 1, 256>}, {pipeline_mode = #tpu.pipeline_mode<synchronous>, transform_indices = @transform_5, window_bounds = array<i64: 256, 896>}, {pipeline_mode = #tpu.pipeline_mode<synchronous>, transform_indices = @transform_6, window_bounds = array<i64: 1, 896>}, {transform_indices = @transform_7, window_bounds = array<i64: 8, 256>}, {transform_indices = @transform_8, window_bounds = array<i64: 8, 256>}, {transform_indices = @transform_9, window_bounds = array<i64: 8, 896>}]} {
    %c0 = arith.constant 0 : index
    %c0_0 = arith.constant 0 : index
    %0 = vector.load %arg1[%c0, %c0_0] : memref<8x128xf32, #tpu.memory_space<vmem>>, vector<8x128xf32>
    %1 = arith.truncf %0 : vector<8x128xf32> to vector<8x128xbf16>
    %c0_1 = arith.constant 0 : index
    %c0_2 = arith.constant 0 : index
    %2 = vector.load %arg2[%c0_1, %c0_2] : memref<128x256xbf16, #tpu.memory_space<vmem>>, vector<128x256xbf16>
    %cst = arith.constant dense<0.000000e+00> : vector<8x256xf32>
    %3 = tpu.matmul %1, %2, %cst {dimension_numbers = #tpu.dot_dimension_numbers<[1], [0], [0], [1], [0, 0, 1, 1], [], []>} : vector<8x128xbf16>, vector<128x256xbf16>, vector<8x256xf32> -> vector<8x256xf32>
    %c0_3 = arith.constant 0 : index
    %c0_4 = arith.constant 0 : index
    %4 = vector.load %arg3[%c0_3, %c0_4] : memref<1x256xf32, #tpu.memory_space<vmem>>, vector<1x256xf32>
    %5 = vector.broadcast %4 : vector<1x256xf32> to vector<8x256xf32>
    %6 = arith.addf %3, %5 : vector<8x256xf32>
    %cst_5 = arith.constant 0.000000e+00 : f32
    %7 = vector.broadcast %cst_5 : f32 to vector<8x256xf32>
    %8 = arith.maximumf %6, %7 : vector<8x256xf32>
    %c0_6 = arith.constant 0 : index
    %c0_7 = arith.constant 0 : index
    %9 = vector.load %arg8[%c0_6, %c0_7] : memref<8x256xf32, #tpu.memory_space<vmem>>, vector<8x256xf32>
    %10 = arith.mulf %8, %9 : vector<8x256xf32>
    %11 = arith.truncf %10 : vector<8x256xf32> to vector<8x256xbf16>
    %c0_8 = arith.constant 0 : index
    %c0_9 = arith.constant 0 : index
    %12 = vector.load %arg4[%c0_8, %c0_9] : memref<256x256xbf16, #tpu.memory_space<vmem>>, vector<256x256xbf16>
    %cst_10 = arith.constant dense<0.000000e+00> : vector<8x256xf32>
    %13 = tpu.matmul %11, %12, %cst_10 {dimension_numbers = #tpu.dot_dimension_numbers<[1], [0], [0], [1], [0, 0, 1, 1], [], []>} : vector<8x256xbf16>, vector<256x256xbf16>, vector<8x256xf32> -> vector<8x256xf32>
    %c0_11 = arith.constant 0 : index
    %c0_12 = arith.constant 0 : index
    %14 = vector.load %arg5[%c0_11, %c0_12] : memref<1x256xf32, #tpu.memory_space<vmem>>, vector<1x256xf32>
    %15 = vector.broadcast %14 : vector<1x256xf32> to vector<8x256xf32>
    %16 = arith.addf %13, %15 : vector<8x256xf32>
    %cst_13 = arith.constant 0.000000e+00 : f32
    %17 = vector.broadcast %cst_13 : f32 to vector<8x256xf32>
    %18 = arith.maximumf %16, %17 : vector<8x256xf32>
    %c0_14 = arith.constant 0 : index
    %c0_15 = arith.constant 0 : index
    %19 = vector.load %arg9[%c0_14, %c0_15] : memref<8x256xf32, #tpu.memory_space<vmem>>, vector<8x256xf32>
    %20 = arith.mulf %18, %19 : vector<8x256xf32>
    %21 = arith.truncf %20 : vector<8x256xf32> to vector<8x256xbf16>
    %c0_16 = arith.constant 0 : index
    %c0_17 = arith.constant 0 : index
    %22 = vector.load %arg6[%c0_16, %c0_17] : memref<256x896xbf16, #tpu.memory_space<vmem>>, vector<256x896xbf16>
    %cst_18 = arith.constant dense<0.000000e+00> : vector<8x896xf32>
    %23 = tpu.matmul %21, %22, %cst_18 {dimension_numbers = #tpu.dot_dimension_numbers<[1], [0], [0], [1], [0, 0, 1, 1], [], []>} : vector<8x256xbf16>, vector<256x896xbf16>, vector<8x896xf32> -> vector<8x896xf32>
    %c0_19 = arith.constant 0 : index
    %c0_20 = arith.constant 0 : index
    %24 = vector.load %arg7[%c0_19, %c0_20] : memref<1x896xf32, #tpu.memory_space<vmem>>, vector<1x896xf32>
    %25 = vector.broadcast %24 : vector<1x896xf32> to vector<8x896xf32>
    %26 = arith.addf %23, %25 : vector<8x896xf32>
    %27 = math.tanh %26 : vector<8x896xf32>
    %c0_21 = arith.constant 0 : index
    %c0_22 = arith.constant 0 : index
    %28 = vector.load %arg10[%c0_21, %c0_22] : memref<8x896xf32, #tpu.memory_space<vmem>>, vector<8x896xf32>
    tpu.vector_store %arg10[%c0_21, %c0_22], %27 {strides = array<i32>} : memref<8x896xf32, #tpu.memory_space<vmem>>, vector<8x896xf32>,
    return
  }
  func.func @transform_0(%arg0: i32) -> (i32, i32) {
    %c0_i32 = arith.constant 0 : i32
    %c0_i32_0 = arith.constant 0 : i32
    return %arg0, %c0_i32 : i32, i32
  }
  func.func @transform_1(%arg0: i32) -> (i32, i32) {
    %c0_i32 = arith.constant 0 : i32
    %c0_i32_0 = arith.constant 0 : i32
    %c0_i32_1 = arith.constant 0 : i32
    return %c0_i32, %c0_i32_0 : i32, i32
  }
  func.func @transform_2(%arg0: i32) -> (i32, i32) {
    %c0_i32 = arith.constant 0 : i32
    %c0_i32_0 = arith.constant 0 : i32
    %c0_i32_1 = arith.constant 0 : i32
    return %c0_i32, %c0_i32_0 : i32, i32
  }
  func.func @transform_3(%arg0: i32) -> (i32, i32) {
    %c0_i32 = arith.constant 0 : i32
    %c0_i32_0 = arith.constant 0 : i32
    %c0_i32_1 = arith.constant 0 : i32
    return %c0_i32, %c0_i32_0 : i32, i32
  }
  func.func @transform_4(%arg0: i32) -> (i32, i32) {
    %c0_i32 = arith.constant 0 : i32
    %c0_i32_0 = arith.constant 0 : i32
    %c0_i32_1 = arith.constant 0 : i32
    return %c0_i32, %c0_i32_0 : i32, i32
  }
  func.func @transform_5(%arg0: i32) -> (i32, i32) {
    %c0_i32 = arith.constant 0 : i32
    %c0_i32_0 = arith.constant 0 : i32
    %c0_i32_1 = arith.constant 0 : i32
    return %c0_i32, %c0_i32_0 : i32, i32
  }
  func.func @transform_6(%arg0: i32) -> (i32, i32) {
    %c0_i32 = arith.constant 0 : i32
    %c0_i32_0 = arith.constant 0 : i32
    %c0_i32_1 = arith.constant 0 : i32
    return %c0_i32, %c0_i32_0 : i32, i32
  }
  func.func @transform_7(%arg0: i32) -> (i32, i32) {
    %c0_i32 = arith.constant 0 : i32
    %c0_i32_0 = arith.constant 0 : i32
    return %arg0, %c0_i32 : i32, i32
  }
  func.func @transform_8(%arg0: i32) -> (i32, i32) {
    %c0_i32 = arith.constant 0 : i32
    %c0_i32_0 = arith.constant 0 : i32
    return %arg0, %c0_i32 : i32, i32
  }
  func.func @transform_9(%arg0: i32) -> (i32, i32) {
    %c0_i32 = arith.constant 0 : i32
    %c0_i32_0 = arith.constant 0 : i32
    return %arg0, %c0_i32 : i32, i32
  }
}

</mosaic_0001>

<bundles_post_ra>
// kernel: tpu_custom_call.1
= control target key start
LH: loop header
LB: loop body
LE: loop exit
PB: predicated region body
PF: predicated region fallthrough
CT: control target
= control target key end

     0   :  { %14 = vsyncpa [#allocation3], 0  ;;  %s2204_s0 = inlined_call_operand.hbm [shape: f32[8,128], index: 0, kind: input, shape index: {}]   ;;  %s2205_s1 = inlined_call_operand.hbm [shape: bf16[128,256], index: 1, kind: input, shape index: {}]   ;;  %s2206_s2 = inlined_call_operand.vmem [shape: f32[1,256], index: 2, kind: input, shape index: {}]   ;;  %s2207_s3 = inlined_call_operand.hbm [shape: bf16[256,256], index: 3, kind: input, shape index: {}]   ;;  %s2208_s4 = inlined_call_operand.hbm [shape: f32[1,256], index: 4, kind: input, shape index: {}]   ;;  %s2209_s5 = inlined_call_operand.hbm [shape: bf16[256,896], index: 5, kind: input, shape index: {}]   ;;  %s2210_s6 = inlined_call_operand.vmem [shape: f32[1,896], index: 6, kind: input, shape index: {}]   ;;  %s2211_s7 = inlined_call_operand.hbm [shape: f32[8,256], index: 7, kind: input, shape index: {}]   ;;  %s2212_s8 = inlined_call_operand.hbm [shape: f32[8,256], index: 8, kind: input, shape index: {}]   ;;  %s2213_s9 = inlined_call_operand.hbm [shape: f32[8,896], index: 9, kind: output, shape index: {}]  }
   0x1   :  { %15 = vsyncpa [#allocation6], 0 }
   0x2   :  { %16 = vsyncpa [#allocation9], 0 }
   0x3   :  { %17 = vsyncpa [#allocation12], 0 }
   0x4   :  { %18 = vsyncpa [#allocation4], 0  ;;  %s2080_s30 = smov [#allocation5]  }
   0x5   :  { %s34_s10 = sshll.u32 %s2080_s30, 4  ;;  %s35_s10 = int_to_ptr.vmem [resolvable:$true] %s34_s10 }
   0x6   :  { %s1918_s11 = scalar_lea.vmem %s35_s10, 2048  ;;  %p1923_p1 = scmp.lt.s32.totalorder %s35_s10, %s35_s10 }
   0x7   :  { %p1919_p0 = scmp.ne.s32.totalorder %s35_s10, %s1918_s11  ;;  %p1924_p2 = scmp.lt.s32.totalorder %s1918_s11, %s1918_s11 }
   0x9   :  { %p1925_p3 = por %p1924_p2, %p1923_p1 }
   0xb   :  { %p1926_p4 = pnand %p1925_p3, %p1919_p0 }
   0xd   :  { %1929 = shalt.err (!%p1926_p4)
}
   0xe   :  { %s2081_s12 = smov 128   ;;  %s2082_s13 = smov 8  }
   0xf   :  { %40 = dma.hbm_to_vmem [thread:$0]  %s2205_s1, 2048, %s35_s10, [#allocation6], %s2081_s12, %s2081_s12, %s2082_s13  }
  0x10   :  { %s2083_s16 = smov [#allocation8]   ;;  %s2084_s18 = smov [#allocation11]  }
  0x11   :  { %s61_s17 = sshll.u32 %s2083_s16, 4  ;;  %s85_s19 = sshll.u32 %s2084_s18, 4  ;;  %s62_s17 = int_to_ptr.vmem [resolvable:$true] %s61_s17  ;;  %s86_s19 = int_to_ptr.vmem [resolvable:$true] %s85_s19 }
  0x12   :  { %s1938_s20 = scalar_lea.vmem %s62_s17, 32  ;;  %p1943_p6 = scmp.lt.s32.totalorder %s62_s17, %s62_s17 }
  0x13   :  { %p1939_p5 = scmp.ne.s32.totalorder %s62_s17, %s1938_s20  ;;  %p1944_p7 = scmp.lt.s32.totalorder %s1938_s20, %s1938_s20 }
  0x15   :  { %p1945_p8 = por %p1944_p7, %p1943_p6 }
  0x17   :  { %p1946_p9 = pnand %p1945_p8, %p1939_p5 }
  0x19   :  { %1949 = shalt.err (!%p1946_p9)
}
  0x1a   :  { %64 = dma.hbm_to_vmem [thread:$0]  %s2208_s4, 32, %s62_s17, [#allocation9]  }
  0x1b   :  { %s1958_s23 = scalar_lea.vmem %s86_s19, 256  ;;  %p1963_p11 = scmp.lt.s32.totalorder %s86_s19, %s86_s19 }
  0x1c   :  { %p1959_p10 = scmp.ne.s32.totalorder %s86_s19, %s1958_s23  ;;  %p1964_p12 = scmp.lt.s32.totalorder %s1958_s23, %s1958_s23 }
  0x1e   :  { %p1965_p13 = por %p1964_p12, %p1963_p11 }
  0x20   :  { %p1966_p0 = pnand %p1965_p13, %p1959_p10 }
  0x22   :  { %1969 = shalt.err (!%p1966_p0)
}
  0x23   :  { %88 = dma.hbm_to_vmem [thread:$0]  %s2211_s7, 256, %s86_s19, [#allocation12]  }
  0x24   :  { %s2085_s25 = smov [#allocation2]   ;;  %s2086_s27 = smov [#allocation7]  }
  0x25   :  { %s25_s26 = sshll.u32 %s2085_s25, 4  ;;  %s48_s28 = sshll.u32 %s2086_s27, 4  ;;  %s26_s26 = int_to_ptr.vmem [resolvable:$true] %s25_s26  ;;  %s49_s28 = int_to_ptr.vmem [resolvable:$true] %s48_s28 }
  0x26   :  { %s1978_s29 = scalar_lea.vmem %s26_s26, 128  ;;  %p1983_p2 = scmp.lt.s32.totalorder %s26_s26, %s26_s26 }
  0x27   :  { %p1979_p1 = scmp.ne.s32.totalorder %s26_s26, %s1978_s29  ;;  %p1984_p3 = scmp.lt.s32.totalorder %s1978_s29, %s1978_s29 }
  0x29   :  { %p1985_p4 = por %p1984_p3, %p1983_p2 }
  0x2b   :  { %p1986_p5 = pnand %p1985_p4, %p1979_p1 }
  0x2d   :  { %1989 = shalt.err (!%p1986_p5)
}
  0x2e   :  { %28 = dma.hbm_to_vmem [thread:$0]  %s2204_s0, 128, %s26_s26, [#allocation3]  }
  0x2f   :  { %s1998_s10 = scalar_lea.vmem %s49_s28, 4096  ;;  %p2003_p7 = scmp.lt.s32.totalorder %s49_s28, %s49_s28 }
  0x30   :  { %p1999_p6 = scmp.ne.s32.totalorder %s49_s28, %s1998_s10  ;;  %p2004_p8 = scmp.lt.s32.totalorder %s1998_s10, %s1998_s10 }
  0x32   :  { %p2005_p9 = por %p2004_p8, %p2003_p7 }
  0x34   :  { %p2006_p10 = pnand %p2005_p9, %p1999_p6 }
  0x36   :  { %2009 = shalt.err (!%p2006_p10)
}
  0x37   :  { %54 = dma.hbm_to_vmem [thread:$0]  %s2207_s3, 4096, %s49_s28, [#allocation6], %s2081_s12, %s2081_s12, %s2082_s13  }
  0x38   :  { %s2087_s14 = smov [#allocation10]  }
  0x39   :  { %s70_s15 = sshll.u32 %s2087_s14, 4  ;;  %s71_s15 = int_to_ptr.vmem [resolvable:$true] %s70_s15 }
  0x3a   :  { %s2018_s16 = scalar_lea.vmem %s71_s15, 14336  ;;  %p2023_p12 = scmp.lt.s32.totalorder %s71_s15, %s71_s15 }
  0x3b   :  { %p2019_p11 = scmp.ne.s32.totalorder %s71_s15, %s2018_s16  ;;  %p2024_p13 = scmp.lt.s32.totalorder %s2018_s16, %s2018_s16 }
  0x3d   :  { %p2025_p0 = por %p2024_p13, %p2023_p12 }
  0x3f   :  { %p2026_p1 = pnand %p2025_p0, %p2019_p11 }
  0x41   :  { %2029 = shalt.err (!%p2026_p1)
}
  0x42   :  { %s2088_s0 = smov 448   ;;  %s2089_s17 = smov 28  }
  0x43   :  { %76 = dma.hbm_to_vmem [thread:$0]  %s2209_s5, 14336, %s71_s15, [#allocation9], %s2088_s0, %s2088_s0, %s2089_s17  }
  0x44   :  { %s2090_s20 = smov [#allocation13]  }
  0x45   :  { %s95_s21 = sshll.u32 %s2090_s20, 4  ;;  %s96_s21 = int_to_ptr.vmem [resolvable:$true] %s95_s21 }
  0x46   :  { %s2038_s3 = scalar_lea.vmem %s96_s21, 256  ;;  %p2043_p3 = scmp.lt.s32.totalorder %s96_s21, %s96_s21 }
  0x47   :  { %p2039_p2 = scmp.ne.s32.totalorder %s96_s21, %s2038_s3  ;;  %p2044_p4 = scmp.lt.s32.totalorder %s2038_s3, %s2038_s3 }
  0x49   :  { %p2045_p5 = por %p2044_p4, %p2043_p3 }
  0x4b   :  { %p2046_p6 = pnand %p2045_p5, %p2039_p2 }
  0x4d   :  { %2049 = shalt.err (!%p2046_p6)
}
  0x4e   :  { %98 = dma.hbm_to_vmem [thread:$0]  %s2212_s8, 256, %s96_s21, [#allocation12]  }
  0x4f   :  { %2070 = dma.done.wait [#allocation3], 128  }
  0x50   :  { %2071 = vsyncadd [#allocation3], 4294967168 }
  0x51   :  { %2072 = dma.done.wait [#allocation6], 6144  }
  0x52   :  { %2073 = vsyncadd [#allocation6], 4294961152 }
  0x53   :  { %2074 = dma.done.wait [#allocation9], 14368  }
  0x54   :  { %2075 = vsyncadd [#allocation9], 4294952928 }
  0x55   :  { %2076 = dma.done.wait [#allocation12], 512  }
  0x56   :  { %2077 = vsyncadd [#allocation12], 4294966784  ;;  %v2091_v0 = vmov 0   ;;  %v1664_v1 = vld [vmem:[#allocation5 + $0x74] ss:$8 sps:$4 sm:$0xff]  }
  0x57   :  { %263 = vmatprep.mubr.bf16.mxu0 %v2091_v0  ;;  %v1666_v2 = vld [vmem:[#allocation5 + $0x70] ss:$8 sps:$4 sm:$0xff]   ;;  %231 = vmatprep.subr.bf16.mxu0 %v1664_v1  ;;  %v1667_v3 = vld [vmem:[#allocation5 + $0x64] ss:$8 sps:$4 sm:$0xff]   ;;  %v1669_v4 = vld [vmem:[#allocation5 + $0x60] ss:$8 sps:$4 sm:$0xff]  }
  0x58   :  { %232 = vmatpush1.bf16.msra.mxu0 %v1666_v2  ;;  %v1670_v5 = vld [vmem:[#allocation5 + $0x54] ss:$8 sps:$4 sm:$0xff]   ;;  %v1672_v6 = vld [vmem:[#allocation5 + $0x50] ss:$8 sps:$4 sm:$0xff]   ;;  %v1673_v7 = vld [vmem:[#allocation5 + $0x44] ss:$8 sps:$4 sm:$0xff]  }
  0x59   :  { %233 = vmatprep.subr.bf16.mxu0 %v1667_v3  ;;  %v1675_v8 = vld [vmem:[#allocation5 + $0x40] ss:$8 sps:$4 sm:$0xff]   ;;  %v1676_v9 = vld [vmem:[#allocation5 + $0x34] ss:$8 sps:$4 sm:$0xff]   ;;  %v1690_v11 = vld [vmem:[#allocation7 + $0x70] ss:$8 sps:$4 sm:$0xff]  }
  0x5a   :  { %v1688_v10 = vld [vmem:[#allocation7 + $0x74] ss:$8 sps:$4 sm:$0xff]   ;;  %v1691_v12 = vld [vmem:[#allocation7 + $0x64] ss:$8 sps:$4 sm:$0xff]   ;;  %v1678_v13 = vld [vmem:[#allocation5 + $0x30] ss:$8 sps:$4 sm:$0xff]  }
  0x5b   :  { %484 = vmatprep.subr.bf16.mxu1 %v1688_v10  ;;  %v1693_v14 = vld [vmem:[#allocation7 + $0x60] ss:$8 sps:$4 sm:$0xff]   ;;  %v1694_v15 = vld [vmem:[#allocation7 + $0x54] ss:$8 sps:$4 sm:$0xff]   ;;  %v1679_v16 = vld [vmem:[#allocation5 + $0x24] ss:$8 sps:$4 sm:$0xff]  }
  0x5c   :  { %234 = vmatpush1.bf16.msra.mxu0 %v1669_v4  ;;  %485 = vmatpush1.bf16.msra.mxu1 %v1690_v11  ;;  %v1681_v17 = vld [vmem:[#allocation5 + $0x20] ss:$8 sps:$4 sm:$0xff]   ;;  %v1696_v18 = vld [vmem:[#allocation7 + $0x50] ss:$8 sps:$4 sm:$0xff]   ;;  %v1697_v19 = vld [vmem:[#allocation7 + $0x44] ss:$8 sps:$4 sm:$0xff]  }
  0x5d   :  { %235 = vmatprep.subr.bf16.mxu0 %v1670_v5  ;;  %486 = vmatprep.subr.bf16.mxu1 %v1691_v12  ;;  %v1682_v20 = vld [vmem:[#allocation5 + $0x14] ss:$8 sps:$4 sm:$0xff]   ;;  %v1684_v21 = vld [vmem:[#allocation5 + $0x10] ss:$8 sps:$4 sm:$0xff]   ;;  %v1699_v22 = vld [vmem:[#allocation7 + $0x40] ss:$8 sps:$4 sm:$0xff]  }
  0x5e   :  { %v1700_v23 = vld [vmem:[#allocation7 + $0x34] ss:$8 sps:$4 sm:$0xff]   ;;  %v1685_v24 = vld [vmem:[#allocation5 + $0x4] ss:$8 sps:$4 sm:$0xff]   ;;  %v1687_v25 = vld [vmem:[#allocation5] ss:$8 sps:$4 sm:$0xff]  }
  0x5f   :  { %v121_v26 = vld [vmem:[#allocation2] sm:$0xff]  ;;  %v1703_v28 = vld [vmem:[#allocation7 + $0x24] ss:$8 sps:$4 sm:$0xff]   ;;  %v1705_v29 = vld [vmem:[#allocation7 + $0x20] ss:$8 sps:$4 sm:$0xff]  }
  0x60   :  { %236 = vmatpush1.bf16.msra.mxu0 %v1672_v6  ;;  %487 = vmatpush1.bf16.msra.mxu1 %v1693_v14  ;;  %v1702_v27 = vld [vmem:[#allocation7 + $0x30] ss:$8 sps:$4 sm:$0xff]   ;;  %v1706_v30 = vld [vmem:[#allocation7 + $0x14] ss:$8 sps:$4 sm:$0xff]   ;;  %v122_v31 = vpack.c.bf16 %v121_v26, %v121_v26  ;;  %v1709_v33 = vld [vmem:[#allocation7 + $0x4] ss:$8 sps:$4 sm:$0xff]  }
  0x61   :  { %237 = vmatprep.subr.bf16.mxu0 %v1673_v7  ;;  %488 = vmatprep.subr.bf16.mxu1 %v1694_v15  ;;  %v1708_v32 = vld [vmem:[#allocation7 + $0x10] ss:$8 sps:$4 sm:$0xff]   ;;  %v1711_v34 = vld [vmem:[#allocation7] ss:$8 sps:$4 sm:$0xff]   ;;  %v1712_v35 = vld [vmem:[#allocation7 + $0xf4] ss:$8 sps:$4 sm:$0xff]  }
  0x62   :  { %v1714_v36 = vld [vmem:[#allocation7 + $0xf0] ss:$8 sps:$4 sm:$0xff]   ;;  %v1715_v37 = vld [vmem:[#allocation7 + $0xe4] ss:$8 sps:$4 sm:$0xff]   ;;  %v1717_v38 = vld [vmem:[#allocation7 + $0xe0] ss:$8 sps:$4 sm:$0xff]  }
  0x63   :  { %v1718_v39 = vld [vmem:[#allocation7 + $0xd4] ss:$8 sps:$4 sm:$0xff]   ;;  %v1720_v40 = vld [vmem:[#allocation7 + $0xd0] ss:$8 sps:$4 sm:$0xff]   ;;  %v1721_v41 = vld [vmem:[#allocation7 + $0xc4] ss:$8 sps:$4 sm:$0xff]  }
  0x64   :  { %238 = vmatpush1.bf16.msra.mxu0 %v1675_v8  ;;  %489 = vmatpush1.bf16.msra.mxu1 %v1696_v18  ;;  %v1723_v42 = vld [vmem:[#allocation7 + $0xc0] ss:$8 sps:$4 sm:$0xff]   ;;  %v1724_v43 = vld [vmem:[#allocation7 + $0xb4] ss:$8 sps:$4 sm:$0xff]   ;;  %v1726_v44 = vld [vmem:[#allocation7 + $0xb0] ss:$8 sps:$4 sm:$0xff]  }
  0x65   :  { %239 = vmatprep.subr.bf16.mxu0 %v1676_v9  ;;  %490 = vmatprep.subr.bf16.mxu1 %v1697_v19  ;;  %v1727_v45 = vld [vmem:[#allocation7 + $0xa4] ss:$8 sps:$4 sm:$0xff]   ;;  %v1729_v46 = vld [vmem:[#allocation7 + $0xa0] ss:$8 sps:$4 sm:$0xff]   ;;  %v1730_v47 = vld [vmem:[#allocation7 + $0x94] ss:$8 sps:$4 sm:$0xff]  }
  0x66   :  { %v1732_v48 = vld [vmem:[#allocation7 + $0x90] ss:$8 sps:$4 sm:$0xff]   ;;  %v1733_v49 = vld [vmem:[#allocation7 + $0x84] ss:$8 sps:$4 sm:$0xff]   ;;  %v1735_v50 = vld [vmem:[#allocation7 + $0x80] ss:$8 sps:$4 sm:$0xff]  }
  0x67   :  { %v1736_v51 = vld [vmem:[#allocation10 + $0x188] ss:$28 sps:$4 sm:$0xff]   ;;  %v1741_v53 = vld [vmem:[#allocation10 + $0x194] ss:$28 sps:$4 sm:$0xff]   ;;  %v1750_v56 = vld [vmem:[#allocation10 + $0x11c] ss:$28 sps:$4 sm:$0xff]  }
  0x68   :  { %240 = vmatpush1.bf16.msra.mxu0 %v1678_v13  ;;  %491 = vmatpush1.bf16.msra.mxu1 %v1699_v22  ;;  %v1738_v52 = vld [vmem:[#allocation10 + $0x18c] ss:$28 sps:$4 sm:$0xff]   ;;  %v1744_v54 = vld [vmem:[#allocation10 + $0x154] ss:$28 sps:$4 sm:$0xff]   ;;  %v1756_v58 = vld [vmem:[#allocation10 + $0xe4] ss:$28 sps:$4 sm:$0xff]  }
  0x69   :  { %241 = vmatprep.subr.bf16.mxu0 %v1679_v16  ;;  %492 = vmatprep.subr.bf16.mxu1 %v1700_v23  ;;  %v1742_v55 = vld [vmem:[#allocation10 + $0x150] ss:$28 sps:$4 sm:$0xff]   ;;  %v1748_v57 = vld [vmem:[#allocation10 + $0x118] ss:$28 sps:$4 sm:$0xff]   ;;  %v1754_v59 = vld [vmem:[#allocation10 + $0xe0] ss:$28 sps:$4 sm:$0xff]   ;;  %v141_v16 = vlaneseq }
  0x6a   :  { %v1762_v60 = vld [vmem:[#allocation10 + $0xac] ss:$28 sps:$4 sm:$0xff]   ;;  %v1768_v62 = vld [vmem:[#allocation10 + $0x74] ss:$28 sps:$4 sm:$0xff]   ;;  %v1774_v0 = vld [vmem:[#allocation10 + $0x3c] ss:$28 sps:$4 sm:$0xff]  }
  0x6b   :  { %v1760_v61 = vld [vmem:[#allocation10 + $0xa8] ss:$28 sps:$4 sm:$0xff]   ;;  %v1766_v63 = vld [vmem:[#allocation10 + $0x70] ss:$28 sps:$4 sm:$0xff]   ;;  %v1772_v1 = vld [vmem:[#allocation10 + $0x38] ss:$28 sps:$4 sm:$0xff]  }
  0x6c   :  { %242 = vmatpush1.bf16.msra.mxu0 %v1681_v17  ;;  %493 = vmatpush1.bf16.msra.mxu1 %v1702_v27  ;;  %v1780_v2 = vld [vmem:[#allocation10 + $0x4] ss:$28 sps:$4 sm:$0xff]   ;;  %v1786_v4 = vld [vmem:[#allocation10 + $0x34c] ss:$28 sps:$4 sm:$0xff]   ;;  %v1792_v6 = vld [vmem:[#allocation10 + $0x314] ss:$28 sps:$4 sm:$0xff]  }
  0x6d   :  { %243 = vmatprep.subr.bf16.mxu0 %v1682_v20  ;;  %494 = vmatprep.subr.bf16.mxu1 %v1703_v28  ;;  %v1778_v3 = vld [vmem:[#allocation10] ss:$28 sps:$4 sm:$0xff]   ;;  %v1784_v5 = vld [vmem:[#allocation10 + $0x348] ss:$28 sps:$4 sm:$0xff]   ;;  %v1790_v7 = vld [vmem:[#allocation10 + $0x310] ss:$28 sps:$4 sm:$0xff]  }
  0x6e   :  { %v1798_v8 = vld [vmem:[#allocation10 + $0x2dc] ss:$28 sps:$4 sm:$0xff]   ;;  %v1804_v10 = vld [vmem:[#allocation10 + $0x2a4] ss:$28 sps:$4 sm:$0xff]   ;;  %v1810_v12 = vld [vmem:[#allocation10 + $0x26c] ss:$28 sps:$4 sm:$0xff]  }
  0x6f   :  { %v1796_v9 = vld [vmem:[#allocation10 + $0x2d8] ss:$28 sps:$4 sm:$0xff]   ;;  %v1802_v11 = vld [vmem:[#allocation10 + $0x2a0] ss:$28 sps:$4 sm:$0xff]   ;;  %v1808_v13 = vld [vmem:[#allocation10 + $0x268] ss:$28 sps:$4 sm:$0xff]  }
  0x70   :  { %244 = vmatpush1.bf16.msra.mxu0 %v1684_v21  ;;  %495 = vmatpush1.bf16.msra.mxu1 %v1705_v29  ;;  %v1816_v14 = vld [vmem:[#allocation10 + $0x234] ss:$28 sps:$4 sm:$0xff]   ;;  %v2170_v17 = vshrl.u32 %v141_v16, 7  ;;  %v274_v27 = vld [vmem:[#allocation11] sm:$0xff] }
  0x71   :  { %245 = vmatprep.subr.bf16.mxu0 %v1685_v24  ;;  %496 = vmatprep.subr.bf16.mxu1 %v1706_v30  ;;  %v1814_v15 = vld [vmem:[#allocation10 + $0x230] ss:$28 sps:$4 sm:$0xff]   ;;  %v139_v19 = vld [vmem:[%s2206_s2] sm:$0x3] }
  0x72   :  { %v2173_v18 = vsub.s32 0, %v2170_v17  ;;  %v2179_v20 = vsub.s32 1, %v2170_v17  ;;  %v275_v30 = vld [vmem:[#allocation11 + $0x8] sm:$0xff] }
  0x74   :  { %246 = vmatpush1.bf16.msra.mxu0 %v1687_v25  ;;  %497 = vmatpush1.bf16.msra.mxu1 %v1708_v32  ;;  %v144_v21 = vrot.slane %v139_v19, %v2173_v18  ;;  %v148_v22 = vrot.slane %v139_v19, %v2179_v20  ;;  %v527_v19 = vld [vmem:[#allocation13] sm:$0xff] }
  0x75   :  { %498 = vmatprep.subr.bf16.mxu1 %v1709_v33  ;;  %1274 = vmatprep.subr.bf16.mxu0 %v1738_v52  ;;  %v1789_v52 = vld [vmem:[#allocation10 + $0x354] ss:$28 sps:$4 sm:$0xff]  }
  0x77   :  { %264 = vmatmul.mubr.bf16.vlgmr.msra.gmra.mxu0 %v122_v31 }
  0x78   :  { %499 = vmatpush1.bf16.msra.mxu1 %v1711_v34  ;;  %1275 = vmatpush1.bf16.msra.mxu0 %v1736_v51  ;;  %v1781_v51 = vld [vmem:[#allocation10 + $0x8] ss:$28 sps:$4 sm:$0xff]  }
  0x79   :  { %500 = vmatprep.subr.bf16.mxu1 %v1712_v35  ;;  %1276 = vmatprep.subr.bf16.mxu0 %v1744_v54  ;;  %v1795_v54 = vld [vmem:[#allocation10 + $0x31c] ss:$28 sps:$4 sm:$0xff]  }
  0x7c   :  { %501 = vmatpush2.bf16.msra.mxu1 %v1714_v36  ;;  %1277 = vmatpush1.bf16.msra.mxu0 %v1742_v55  ;;  %v1739_v36 = vld [vmem:[#allocation10 + $0x190] ss:$28 sps:$4 sm:$0xff]   ;;  %v1793_v55 = vld [vmem:[#allocation10 + $0x318] ss:$28 sps:$4 sm:$0xff]  }
  0x7d   :  { %502 = vmatprep.subr.bf16.mxu1 %v1715_v37  ;;  %1278 = vmatprep.subr.bf16.mxu0 %v1750_v56  ;;  %v1801_v56 = vld [vmem:[#allocation10 + $0x2e4] ss:$28 sps:$4 sm:$0xff]  }
  0x80   :  { %503 = vmatpush2.bf16.msra.mxu1 %v1717_v38  ;;  %1279 = vmatpush1.bf16.msra.mxu0 %v1748_v57  ;;  %v1747_v38 = vld [vmem:[#allocation10 + $0x15c] ss:$28 sps:$4 sm:$0xff]  }
  0x81   :  { %504 = vmatprep.subr.bf16.mxu1 %v1718_v39  ;;  %1280 = vmatprep.subr.bf16.mxu0 %v1756_v58  ;;  %v1745_v39 = vld [vmem:[#allocation10 + $0x158] ss:$28 sps:$4 sm:$0xff]   ;;  %v1799_v57 = vld [vmem:[#allocation10 + $0x2e0] ss:$28 sps:$4 sm:$0xff]   ;;  %v1807_v58 = vld [vmem:[#allocation10 + $0x2ac] ss:$28 sps:$4 sm:$0xff]  }
  0x84   :  { %505 = vmatpush2.bf16.msra.mxu1 %v1720_v40  ;;  %1281 = vmatpush1.bf16.msra.mxu0 %v1754_v59  ;;  %v1753_v40 = vld [vmem:[#allocation10 + $0x124] ss:$28 sps:$4 sm:$0xff]  }
  0x85   :  { %506 = vmatprep.subr.bf16.mxu1 %v1721_v41  ;;  %1282 = vmatprep.subr.bf16.mxu0 %v1762_v60  ;;  %v1751_v41 = vld [vmem:[#allocation10 + $0x120] ss:$28 sps:$4 sm:$0xff]   ;;  %v1805_v59 = vld [vmem:[#allocation10 + $0x2a8] ss:$28 sps:$4 sm:$0xff]   ;;  %v1813_v60 = vld [vmem:[#allocation10 + $0x274] ss:$28 sps:$4 sm:$0xff]  }
  0x88   :  { %507 = vmatpush2.bf16.msra.mxu1 %v1723_v42  ;;  %1283 = vmatpush1.bf16.msra.mxu0 %v1760_v61  ;;  %v1759_v42 = vld [vmem:[#allocation10 + $0xec] ss:$28 sps:$4 sm:$0xff]  }
  0x89   :  { %508 = vmatprep.subr.bf16.mxu1 %v1724_v43  ;;  %1284 = vmatprep.subr.bf16.mxu0 %v1768_v62  ;;  %v1757_v43 = vld [vmem:[#allocation10 + $0xe8] ss:$28 sps:$4 sm:$0xff]   ;;  %v1811_v61 = vld [vmem:[#allocation10 + $0x270] ss:$28 sps:$4 sm:$0xff]   ;;  %v1819_v62 = vld [vmem:[#allocation10 + $0x23c] ss:$28 sps:$4 sm:$0xff]  }
  0x8c   :  { %509 = vmatpush2.bf16.msra.mxu1 %v1726_v44  ;;  %1285 = vmatpush1.bf16.msra.mxu0 %v1766_v63  ;;  %v1765_v44 = vld [vmem:[#allocation10 + $0xb4] ss:$28 sps:$4 sm:$0xff]  }
  0x8d   :  { %510 = vmatprep.subr.bf16.mxu1 %v1727_v45  ;;  %1286 = vmatprep.subr.bf16.mxu0 %v1774_v0  ;;  %v1763_v45 = vld [vmem:[#allocation10 + $0xb0] ss:$28 sps:$4 sm:$0xff]   ;;  %v1817_v63 = vld [vmem:[#allocation10 + $0x238] ss:$28 sps:$4 sm:$0xff]  }
  0x8e   :  { %v1822_v0 = vld [vmem:[#allocation10 + $0x1fc] ss:$28 sps:$4 sm:$0xff]  }
  0x90   :  { %511 = vmatpush2.bf16.msra.mxu1 %v1729_v46  ;;  %1287 = vmatpush1.bf16.msra.mxu0 %v1772_v1  ;;  %v1771_v46 = vld [vmem:[#allocation10 + $0x7c] ss:$28 sps:$4 sm:$0xff]   ;;  %v1825_v1 = vld [vmem:[#allocation10 + $0x204] ss:$28 sps:$4 sm:$0xff]  }
  0x91   :  { %512 = vmatprep.subr.bf16.mxu1 %v1730_v47  ;;  %1288 = vmatprep.subr.bf16.mxu0 %v1780_v2  ;;  %v1769_v47 = vld [vmem:[#allocation10 + $0x78] ss:$28 sps:$4 sm:$0xff]  }
  0x92   :  { %v1820_v2 = vld [vmem:[#allocation10 + $0x1f8] ss:$28 sps:$4 sm:$0xff]  }
  0x94   :  { %513 = vmatpush2.bf16.msra.mxu1 %v1732_v48  ;;  %1289 = vmatpush1.bf16.msra.mxu0 %v1778_v3  ;;  %v1777_v48 = vld [vmem:[#allocation10 + $0x44] ss:$28 sps:$4 sm:$0xff]  }
  0x95   :  { %514 = vmatprep.subr.bf16.mxu1 %v1733_v49  ;;  %1290 = vmatprep.subr.bf16.mxu0 %v1786_v4  ;;  %v1775_v49 = vld [vmem:[#allocation10 + $0x40] ss:$28 sps:$4 sm:$0xff]  }
  0x96   :  { %v1823_v3 = vld [vmem:[#allocation10 + $0x200] ss:$28 sps:$4 sm:$0xff]  }
  0x97   :  { %v1828_v4 = vld [vmem:[#allocation10 + $0x1c4] ss:$28 sps:$4 sm:$0xff]  }
  0x98   :  { %515 = vmatpush2.bf16.msra.mxu1 %v1735_v50  ;;  %1291 = vmatpush2.bf16.msra.mxu0 %v1784_v5  ;;  %v1783_v50 = vld [vmem:[#allocation10 + $0xc] ss:$28 sps:$4 sm:$0xff]  }
  0x99   :  { %1315 = vmatprep.subr.bf16.mxu1 %v1741_v53  ;;  %1292 = vmatprep.subr.bf16.mxu0 %v1792_v6  ;;  %v1787_v53 = vld [vmem:[#allocation10 + $0x350] ss:$28 sps:$4 sm:$0xff]   ;;  %v1826_v6 = vld [vmem:[#allocation10 + $0x1c0] ss:$28 sps:$4 sm:$0xff]  }
  0x9a   :  { %v1831_v5 = vld [vmem:[#allocation10 + $0x1cc] ss:$28 sps:$4 sm:$0xff]  }
  0x9c   :  { %1293 = vmatpush2.bf16.msra.mxu0 %v1790_v7  ;;  %v1829_v7 = vld [vmem:[#allocation10 + $0x1c8] ss:$28 sps:$4 sm:$0xff]  }
  0x9d   :  { %1294 = vmatprep.subr.bf16.mxu0 %v1798_v8  ;;  %v1834_v8 = vld [vmem:[#allocation10 + $0x19c] ss:$28 sps:$4 sm:$0xff]  }
  0xa0   :  { %1295 = vmatpush2.bf16.msra.mxu0 %v1796_v9  ;;  %v1835_v9 = vld [vmem:[#allocation10 + $0x360] ss:$28 sps:$4 sm:$0xff]  }
  0xa1   :  { %1296 = vmatprep.subr.bf16.mxu0 %v1804_v10  ;;  %v312_v10 = vld [vmem:[#allocation8] sm:$0x3] }
  0xa4   :  { %1297 = vmatpush2.bf16.msra.mxu0 %v1802_v11  ;;  %v317_v11 = vrot.slane %v312_v10, %v2173_v18 }
  0xa5   :  { %1298 = vmatprep.subr.bf16.mxu0 %v1810_v12  ;;  %v321_v12 = vrot.slane %v312_v10, %v2179_v20  ;;  %v1895_v10 = vld [vmem:[#allocation10 + $0x1d4] ss:$28 sps:$4 sm:$0xff]  }
  0xa8   :  { %1299 = vmatpush2.bf16.msra.mxu0 %v1808_v13 }
  0xa9   :  { %1300 = vmatprep.subr.bf16.mxu0 %v1816_v14 }
  0xac   :  { %1301 = vmatpush2.bf16.msra.mxu0 %v1814_v15 }
  0xad   :  { %1302 = vmatprep.subr.bf16.mxu0 %v1822_v0  ;;  %v1880_v0 = vld [vmem:[#allocation10 + $0x2ec] ss:$28 sps:$4 sm:$0xff]  }
  0xb0   :  { %1303 = vmatpush2.bf16.msra.mxu0 %v1820_v2  ;;  %v1883_v2 = vld [vmem:[#allocation10 + $0x2b4] ss:$28 sps:$4 sm:$0xff]  }
  0xb1   :  { %1304 = vmatprep.subr.bf16.mxu0 %v1828_v4  ;;  %v1886_v4 = vld [vmem:[#allocation10 + $0x27c] ss:$28 sps:$4 sm:$0xff]  }
  0xb4   :  { %1305 = vmatpush2.bf16.msra.mxu0 %v1826_v6  ;;  %v1889_v6 = vld [vmem:[#allocation10 + $0x244] ss:$28 sps:$4 sm:$0xff]  }
  0xb5   :  { %1356 = vmatprep.subr.bf16.mxu0 %v1834_v8  ;;  %v1892_v8 = vld [vmem:[#allocation10 + $0x20c] ss:$28 sps:$4 sm:$0xff]  }
 0x137   :  { %v265_v23 = vpop.f32.mrf.mxu0 }
 0x138   :  { %v266_v24 = vadd.f32 %v265_v23, %v144_v21 }
 0x139   :  { %v267_v25 = vpop.f32.mrf.mxu0 }
 0x13a   :  { %v272_v26 = vmax.f32 %v266_v24, 0.0  ;;  %v268_v28 = vadd.f32 %v267_v25, %v148_v22  ;;  %v528_v22 = vld [vmem:[#allocation13 + $0x8] sm:$0xff] }
 0x13b   :  { %v269_v29 = vpop.f32.mrf.mxu0 }
 0x13c   :  { %v273_v31 = vmax.f32 %v268_v28, 0.0  ;;  %v276_v32 = vmul.f32 %v274_v27, %v272_v26  ;;  %v1832_v29 = vld [vmem:[#allocation10 + $0x198] ss:$28 sps:$4 sm:$0xff]  }
 0x13d   :  { %v270_v33 = vpop.f32.mrf.mxu0 }
 0x13e   :  { %v277_v34 = vmul.f32 %v275_v30, %v273_v31  ;;  %v278_v37 = vpack.c.bf16 %v276_v32, %v276_v32  ;;  %v1836_v30 = vld [vmem:[#allocation10 + $0x1a0] ss:$28 sps:$4 sm:$0xff]   ;;  %v1840_v33 = vld [vmem:[#allocation10 + $0x328] ss:$28 sps:$4 sm:$0xff]  }
 0x13f   :  { %v1839_v32 = vld [vmem:[#allocation10 + $0x164] ss:$28 sps:$4 sm:$0xff]  }
 0x140   :  { %v279_v35 = vpack.c.bf16 %v277_v34, %v277_v34  ;;  %v1837_v34 = vld [vmem:[#allocation10 + $0x160] ss:$28 sps:$4 sm:$0xff]  }
 0x142   :  { %516 = vmatprep.mubr.bf16.mxu1 %v279_v35  ;;  %v1841_v35 = vld [vmem:[#allocation10 + $0x168] ss:$28 sps:$4 sm:$0xff]  }
 0x143   :  { %517 = vmatmul.mubr.bf16.vlgmr.msra.gmra.mxu1 %v278_v37  ;;  %v1845_v37 = vld [vmem:[#allocation10 + $0x2f0] ss:$28 sps:$4 sm:$0xff]  }
 0x144   :  { %1316 = vmatpush1.bf16.msra.mxu1 %v1739_v36  ;;  %v1844_v36 = vld [vmem:[#allocation10 + $0x12c] ss:$28 sps:$4 sm:$0xff]  }
 0x145   :  { %1317 = vmatprep.subr.bf16.mxu1 %v1747_v38  ;;  %v1842_v38 = vld [vmem:[#allocation10 + $0x128] ss:$28 sps:$4 sm:$0xff]  }
 0x148   :  { %1318 = vmatpush1.bf16.msra.mxu1 %v1745_v39  ;;  %v1846_v39 = vld [vmem:[#allocation10 + $0x130] ss:$28 sps:$4 sm:$0xff]  }
 0x149   :  { %1319 = vmatprep.subr.bf16.mxu1 %v1753_v40  ;;  %v1849_v40 = vld [vmem:[#allocation10 + $0xf4] ss:$28 sps:$4 sm:$0xff]  }
 0x14c   :  { %1320 = vmatpush1.bf16.msra.mxu1 %v1751_v41  ;;  %v1850_v41 = vld [vmem:[#allocation10 + $0x2b8] ss:$28 sps:$4 sm:$0xff]  }
 0x14d   :  { %1321 = vmatprep.subr.bf16.mxu1 %v1759_v42  ;;  %v1847_v42 = vld [vmem:[#allocation10 + $0xf0] ss:$28 sps:$4 sm:$0xff]  }
 0x150   :  { %1322 = vmatpush1.bf16.msra.mxu1 %v1757_v43  ;;  %v1851_v43 = vld [vmem:[#allocation10 + $0xf8] ss:$28 sps:$4 sm:$0xff]  }
 0x151   :  { %1323 = vmatprep.subr.bf16.mxu1 %v1765_v44  ;;  %v1854_v44 = vld [vmem:[#allocation10 + $0xbc] ss:$28 sps:$4 sm:$0xff]  }
 0x154   :  { %1324 = vmatpush1.bf16.msra.mxu1 %v1763_v45  ;;  %v1855_v45 = vld [vmem:[#allocation10 + $0x280] ss:$28 sps:$4 sm:$0xff]  }
 0x155   :  { %1325 = vmatprep.subr.bf16.mxu1 %v1771_v46  ;;  %v1852_v46 = vld [vmem:[#allocation10 + $0xb8] ss:$28 sps:$4 sm:$0xff]  }
 0x158   :  { %1326 = vmatpush1.bf16.msra.mxu1 %v1769_v47  ;;  %v1856_v47 = vld [vmem:[#allocation10 + $0xc0] ss:$28 sps:$4 sm:$0xff]  }
 0x159   :  { %1327 = vmatprep.subr.bf16.mxu1 %v1777_v48  ;;  %v1859_v48 = vld [vmem:[#allocation10 + $0x84] ss:$28 sps:$4 sm:$0xff]  }
 0x15c   :  { %1328 = vmatpush1.bf16.msra.mxu1 %v1775_v49  ;;  %v1860_v49 = vld [vmem:[#allocation10 + $0x248] ss:$28 sps:$4 sm:$0xff]  }
 0x15d   :  { %1329 = vmatprep.subr.bf16.mxu1 %v1783_v50  ;;  %v1857_v50 = vld [vmem:[#allocation10 + $0x80] ss:$28 sps:$4 sm:$0xff]  }
 0x160   :  { %1330 = vmatpush1.bf16.msra.mxu1 %v1781_v51  ;;  %v1861_v51 = vld [vmem:[#allocation10 + $0x88] ss:$28 sps:$4 sm:$0xff]  }
 0x161   :  { %1331 = vmatprep.subr.bf16.mxu1 %v1789_v52  ;;  %v1864_v52 = vld [vmem:[#allocation10 + $0x4c] ss:$28 sps:$4 sm:$0xff]  }
 0x164   :  { %1332 = vmatpush2.bf16.msra.mxu1 %v1787_v53  ;;  %v1865_v53 = vld [vmem:[#allocation10 + $0x210] ss:$28 sps:$4 sm:$0xff]  }
 0x165   :  { %1333 = vmatprep.subr.bf16.mxu1 %v1795_v54  ;;  %v1862_v54 = vld [vmem:[#allocation10 + $0x48] ss:$28 sps:$4 sm:$0xff]  }
 0x168   :  { %1334 = vmatpush2.bf16.msra.mxu1 %v1793_v55  ;;  %v1866_v55 = vld [vmem:[#allocation10 + $0x50] ss:$28 sps:$4 sm:$0xff]  }
 0x169   :  { %1335 = vmatprep.subr.bf16.mxu1 %v1801_v56  ;;  %v1869_v56 = vld [vmem:[#allocation10 + $0x14] ss:$28 sps:$4 sm:$0xff]  }
 0x16c   :  { %1336 = vmatpush2.bf16.msra.mxu1 %v1799_v57  ;;  %v1870_v57 = vld [vmem:[#allocation10 + $0x1d8] ss:$28 sps:$4 sm:$0xff]  }
 0x16d   :  { %1337 = vmatprep.subr.bf16.mxu1 %v1807_v58  ;;  %v1867_v58 = vld [vmem:[#allocation10 + $0x10] ss:$28 sps:$4 sm:$0xff]  }
 0x170   :  { %1338 = vmatpush2.bf16.msra.mxu1 %v1805_v59  ;;  %v1871_v59 = vld [vmem:[#allocation10 + $0x18] ss:$28 sps:$4 sm:$0xff]  }
 0x171   :  { %1339 = vmatprep.subr.bf16.mxu1 %v1813_v60  ;;  %v1874_v60 = vld [vmem:[#allocation10 + $0x35c] ss:$28 sps:$4 sm:$0xff]  }
 0x174   :  { %1340 = vmatpush2.bf16.msra.mxu1 %v1811_v61  ;;  %v1872_v61 = vld [vmem:[#allocation10 + $0x358] ss:$28 sps:$4 sm:$0xff]  }
 0x175   :  { %1341 = vmatprep.subr.bf16.mxu1 %v1819_v62  ;;  %v1877_v62 = vld [vmem:[#allocation10 + $0x324] ss:$28 sps:$4 sm:$0xff]  }
 0x178   :  { %1342 = vmatpush2.bf16.msra.mxu1 %v1817_v63  ;;  %v1875_v63 = vld [vmem:[#allocation10 + $0x320] ss:$28 sps:$4 sm:$0xff]  }
 0x179   :  { %1343 = vmatprep.subr.bf16.mxu1 %v1825_v1  ;;  %v1878_v1 = vld [vmem:[#allocation10 + $0x2e8] ss:$28 sps:$4 sm:$0xff]  }
 0x17c   :  { %1344 = vmatpush2.bf16.msra.mxu1 %v1823_v3  ;;  %v1881_v3 = vld [vmem:[#allocation10 + $0x2b0] ss:$28 sps:$4 sm:$0xff]  }
 0x17d   :  { %1345 = vmatprep.subr.bf16.mxu1 %v1831_v5  ;;  %v1884_v5 = vld [vmem:[#allocation10 + $0x278] ss:$28 sps:$4 sm:$0xff]  }
 0x180   :  { %1346 = vmatpush2.bf16.msra.mxu1 %v1829_v7  ;;  %v1887_v7 = vld [vmem:[#allocation10 + $0x240] ss:$28 sps:$4 sm:$0xff]  }
 0x181   :  { %1629 = vmatprep.subr.bf16.mxu1 %v1835_v9  ;;  %v1890_v9 = vld [vmem:[#allocation10 + $0x208] ss:$28 sps:$4 sm:$0xff]  }
 0x203   :  { %v518_v13 = vpop.f32.mrf.mxu1 }
 0x204   :  { %v519_v14 = vadd.f32 %v518_v13, %v317_v11  ;;  %v1893_v11 = vld [vmem:[#allocation10 + $0x1d0] ss:$28 sps:$4 sm:$0xff]   ;;  %v661_v13 = vld [vmem:[%s2210_s6] sm:$0xff]  ;;  %s2092_s6 = smov [#allocation14]  }
 0x205   :  { %v520_v15 = vpop.f32.mrf.mxu1  ;;  %s1457_s23 = sshll.u32 %s2092_s6, 4  ;;  %s1458_s23 = int_to_ptr.vmem [resolvable:$true] %s1457_s23 }
 0x206   :  { %v525_v16 = vmax.f32 %v519_v14, 0.0  ;;  %v521_v21 = vadd.f32 %v520_v15, %v321_v12  ;;  %v673_v12 = vsub.s32 2, %v2170_v17  ;;  %v677_v14 = vsub.s32 3, %v2170_v17  ;;  %s2050_s1 = scalar_lea.vmem %s1458_s23, 896  ;;  %p2055_p8 = scmp.lt.s32.totalorder %s1458_s23, %s1458_s23 }
 0x207   :  { %v522_v23 = vpop.f32.mrf.mxu1  ;;  %v666_v15 = vrot.slane %v661_v13, %v2173_v18  ;;  %p2051_p7 = scmp.ne.s32.totalorder %s1458_s23, %s2050_s1  ;;  %p2056_p9 = scmp.lt.s32.totalorder %s2050_s1, %s2050_s1 }
 0x208   :  { %v526_v24 = vmax.f32 %v521_v21, 0.0  ;;  %v529_v25 = vmul.f32 %v527_v19, %v525_v16  ;;  %v674_v16 = vrot.slane %v661_v13, %v673_v12  ;;  %v670_v19 = vrot.slane %v661_v13, %v2179_v20 }
 0x209   :  { %v523_v26 = vpop.f32.mrf.mxu1  ;;  %v678_v21 = vrot.slane %v661_v13, %v677_v14  ;;  %p2057_p10 = por %p2056_p9, %p2055_p8 }
 0x20a   :  { %v530_v27 = vmul.f32 %v528_v22, %v526_v24  ;;  %v2185_v31 = vpack.c.bf16 %v529_v25, %v529_v25 }
 0x20b   :  { %p2058_p11 = pnand %p2057_p10, %p2051_p7 }
 0x20c   :  { %v532_v28 = vpack.c.bf16 %v530_v27, %v530_v27 }
 0x20e   :  { %1306 = vmatprep.mubr.bf16.mxu0 %v532_v28  ;;  %1347 = vmatprep.mubr.bf16.mxu1 %v532_v28 }
 0x20f   :  { %1307 = vmatmul.mubr.bf16.vlgmr.msra.gmra.mxu0 %v2185_v31  ;;  %1348 = vmatmul.mubr.bf16.vlgmr.msra.gmra.mxu1 %v2185_v31 }
 0x210   :  { %1357 = vmatpush1.bf16.msra.mxu0 %v1832_v29  ;;  %1630 = vmatpush3.bf16.msra.mxu1 %v1836_v30 }
 0x211   :  { %1388 = vmatprep.mubr.bf16.mxu0 %v532_v28  ;;  %1429 = vmatprep.mubr.bf16.mxu1 %v532_v28 }
 0x212   :  { %1358 = vmatprep.subr.bf16.mxu0 %v1839_v32  ;;  %1631 = vmatprep.subr.bf16.mxu1 %v1840_v33 }
 0x214   :  { %1359 = vmatpush1.bf16.msra.mxu0 %v1837_v34  ;;  %1632 = vmatpush3.bf16.msra.mxu1 %v1841_v35 }
 0x215   :  { %1360 = vmatprep.subr.bf16.mxu0 %v1844_v36  ;;  %1633 = vmatprep.subr.bf16.mxu1 %v1845_v37  ;;  %v689_v36 = vsub.s32 6, %v2170_v17 }
 0x218   :  { %1361 = vmatpush1.bf16.msra.mxu0 %v1842_v38  ;;  %1634 = vmatpush3.bf16.msra.mxu1 %v1846_v39  ;;  %v690_v38 = vrot.slane %v661_v13, %v689_v36 }
 0x219   :  { %1362 = vmatprep.subr.bf16.mxu0 %v1849_v40  ;;  %1635 = vmatprep.subr.bf16.mxu1 %v1850_v41 }
 0x21c   :  { %1363 = vmatpush1.bf16.msra.mxu0 %v1847_v42  ;;  %1636 = vmatpush3.bf16.msra.mxu1 %v1851_v43 }
 0x21d   :  { %1364 = vmatprep.subr.bf16.mxu0 %v1854_v44  ;;  %1637 = vmatprep.subr.bf16.mxu1 %v1855_v45  ;;  %v681_v45 = vsub.s32 4, %v2170_v17 }
 0x220   :  { %1365 = vmatpush1.bf16.msra.mxu0 %v1852_v46  ;;  %1638 = vmatpush3.bf16.msra.mxu1 %v1856_v47  ;;  %v685_v46 = vsub.s32 5, %v2170_v17  ;;  %v682_v47 = vrot.slane %v661_v13, %v681_v45 }
 0x221   :  { %1366 = vmatprep.subr.bf16.mxu0 %v1859_v48  ;;  %1639 = vmatprep.subr.bf16.mxu1 %v1860_v49 }
 0x222   :  { %v686_v48 = vrot.slane %v661_v13, %v685_v46 }
 0x224   :  { %1367 = vmatpush1.bf16.msra.mxu0 %v1857_v50  ;;  %1640 = vmatpush3.bf16.msra.mxu1 %v1861_v51 }
 0x225   :  { %1368 = vmatprep.subr.bf16.mxu0 %v1864_v52  ;;  %1641 = vmatprep.subr.bf16.mxu1 %v1865_v53 }
 0x228   :  { %1369 = vmatpush1.bf16.msra.mxu0 %v1862_v54  ;;  %1642 = vmatpush3.bf16.msra.mxu1 %v1866_v55 }
 0x229   :  { %1370 = vmatprep.subr.bf16.mxu0 %v1869_v56  ;;  %1643 = vmatprep.subr.bf16.mxu1 %v1870_v57 }
 0x22c   :  { %1371 = vmatpush1.bf16.msra.mxu0 %v1867_v58  ;;  %1644 = vmatpush3.bf16.msra.mxu1 %v1871_v59 }
 0x22d   :  { %1372 = vmatprep.subr.bf16.mxu0 %v1874_v60 }
 0x22f   :  { %1430 = vmatmul.mubr.bf16.vlgmr.msra.gmra.mxu1 %v2185_v31 }
 0x230   :  { %1373 = vmatpush2.bf16.msra.mxu0 %v1872_v61 }
 0x231   :  { %1374 = vmatprep.subr.bf16.mxu0 %v1877_v62 }
 0x234   :  { %1375 = vmatpush2.bf16.msra.mxu0 %v1875_v63 }
 0x235   :  { %1376 = vmatprep.subr.bf16.mxu0 %v1880_v0 }
 0x238   :  { %1377 = vmatpush2.bf16.msra.mxu0 %v1878_v1 }
 0x239   :  { %1378 = vmatprep.subr.bf16.mxu0 %v1883_v2 }
 0x23c   :  { %1379 = vmatpush2.bf16.msra.mxu0 %v1881_v3 }
 0x23d   :  { %1380 = vmatprep.subr.bf16.mxu0 %v1886_v4 }
 0x240   :  { %1381 = vmatpush2.bf16.msra.mxu0 %v1884_v5 }
 0x241   :  { %1382 = vmatprep.subr.bf16.mxu0 %v1889_v6 }
 0x244   :  { %1383 = vmatpush2.bf16.msra.mxu0 %v1887_v7 }
 0x245   :  { %1384 = vmatprep.subr.bf16.mxu0 %v1892_v8 }
 0x248   :  { %1385 = vmatpush2.bf16.msra.mxu0 %v1890_v9 }
 0x249   :  { %1386 = vmatprep.subr.bf16.mxu0 %v1895_v10 }
 0x24c   :  { %1387 = vmatpush2.bf16.msra.mxu0 %v1893_v11 }
 0x24f   :  { %1389 = vmatmul.mubr.bf16.vlgmr.msra.gmra.mxu0 %v2185_v31 }
 0x2cf   :  { %v1308_v22 = vpop.f32.mrf.mxu0  ;;  %v1349_v23 = vpop.f32.mrf.mxu1 }
 0x2d0   :  { %v1309_v24 = vadd.f32 %v1308_v22, %v666_v15  ;;  %v1350_v25 = vadd.f32 %v1349_v23, %v674_v16 }
 0x2d1   :  { %v1310_v26 = vpop.f32.mrf.mxu0  ;;  %v1351_v27 = vpop.f32.mrf.mxu1 }
 0x2d2   :  { %1896 = vtanh.f32 %v1309_v24  ;;  %v1311_v28 = vadd.f32 %v1310_v26, %v670_v19  ;;  %v1352_v29 = vadd.f32 %v1351_v27, %v678_v21 }
 0x2d3   :  { %1898 = vtanh.f32 %v1350_v25  ;;  %v1312_v30 = vpop.f32.mrf.mxu0  ;;  %v1353_v31 = vpop.f32.mrf.mxu1 }
 0x2d4   :  { %1900 = vtanh.f32 %v1311_v28 }
 0x2d5   :  { %1902 = vtanh.f32 %v1352_v29  ;;  %v1313_v32 = vpop.f32.mrf.mxu0  ;;  %v1354_v18 = vpop.f32.mrf.mxu1 }
 0x2df   :  { %v1897_v33 = vpop.eup %1896 }
 0x2e0   :  { %v1899_v34 = vpop.eup %1898  ;;  %1444 = vst [vmem:[#allocation14] sm:$0xff] %v1897_v33 }
 0x2e1   :  { %v1901_v20 = vpop.eup %1900  ;;  %1446 = vst [vmem:[#allocation14 + $0x10] sm:$0xff] %v1899_v34 }
 0x2e2   :  { %v1903_v35 = vpop.eup %1902  ;;  %1445 = vst [vmem:[#allocation14 + $0x8] sm:$0xff] %v1901_v20 }
 0x2e3   :  { %1447 = vst [vmem:[#allocation14 + $0x18] sm:$0xff] %v1903_v35 }
 0x2ef   :  { %v1645_v37 = vpop.f32.mrf.mxu1 }
 0x2f1   :  { %v1646_v39 = vpop.f32.mrf.mxu1 }
 0x2f2   :  { %v1647_v40 = vadd.f32 %v1646_v39, %v1645_v37 }
 0x2f3   :  { %v1648_v41 = vpop.f32.mrf.mxu1 }
 0x2f4   :  { %v1432_v42 = vadd.f32 %v1647_v40, %v690_v38 }
 0x2f5   :  { %v1649_v43 = vpop.f32.mrf.mxu1 }
 0x2f6   :  { %1904 = vtanh.f32 %v1432_v42 }
 0x303   :  { %v1905_v44 = vpop.eup %1904 }
 0x304   :  { %1450 = vst [vmem:[#allocation14 + $0x30] sm:$0xff] %v1905_v44 }
 0x30f   :  { %v1390_v49 = vpop.f32.mrf.mxu0 }
 0x310   :  { %v1391_v50 = vadd.f32 %v1390_v49, %v682_v47 }
 0x311   :  { %v1392_v51 = vpop.f32.mrf.mxu0 }
 0x312   :  { %1906 = vtanh.f32 %v1391_v50  ;;  %v1393_v52 = vadd.f32 %v1392_v51, %v686_v48 }
 0x313   :  { %v1394_v53 = vpop.f32.mrf.mxu0 }
 0x314   :  { %1908 = vtanh.f32 %v1393_v52 }
 0x315   :  { %v1395_v54 = vpop.f32.mrf.mxu0 }
 0x31f   :  { %v1907_v55 = vpop.eup %1906 }
 0x320   :  { %1448 = vst [vmem:[#allocation14 + $0x20] sm:$0xff] %v1907_v55 }
 0x321   :  { %v1909_v56 = vpop.eup %1908 }
 0x322   :  { %1449 = vst [vmem:[#allocation14 + $0x28] sm:$0xff] %v1909_v56 }
 0x323   :  { %2061 = shalt.err (!%p2058_p11)
}
 0x324   :  { %1460 = dma.vmem_to_hbm [thread:$0]  %s1458_s23, 896, %s2213_s9, [#allocation4]  }
 0x325   :  { %2078 = dma.done.wait [#allocation4], 896  }
 0x326   :  { %2079 = vsyncadd [#allocation4], 4294966400 }
 0x327   :  { %1464 = vsyncpa [#allocation3], 1 }
 0x328   :  { %1465 = vsyncpa [#allocation6], 1 }
 0x329   :  { %1466 = vsyncpa [#allocation9], 1 }
 0x32a   :  { %1467 = vsyncpa [#allocation12], 1 }
 0x32b   :  { %1468 = vsyncpa [#allocation4], 1 }

</bundles_post_ra>
